<compile_context>
chip_gen: v5e
topology: v5e:2x2
jax: 0.10.0
libtpu: 0.0.40
codegen_flags: <defaults>
</compile_context>

<pallas_src>
import functools

import jax
import jax.numpy as jnp
from jax.experimental import pallas as pl
from jax.experimental.pallas import tpu as pltpu


def _round_up(x, m):
    return ((x + m - 1) // m) * m


def linear_kernel(x_ref, w_ref, b_ref, o_ref):
    # x_ref: (tm, D) f32   w_ref: (D, L) bf16   b_ref: (1, L) f32
    # o_ref: (tm, L) f32
    # bf16 cast of the x tile runs on the VPU, fully hidden under the x DMA.
    x_bf16 = x_ref[...].astype(jnp.bfloat16)
    acc = jnp.dot(x_bf16, w_ref[...], preferred_element_type=jnp.float32)
    o_ref[...] = acc + b_ref[...]          # f32 epilogue (bias add) on the VPU


def prepare_params(weight, bias):
    """One-time parameter prep (do NOT call per forward).

    weight: (L, D) torch-layout  ->  (D, L) bf16, contiguous in HBM
    bias:   (L,)                 ->  (1, L) f32
    """
    w_t_bf16 = jnp.asarray(weight, jnp.float32).T.astype(jnp.bfloat16)
    b_f32 = jnp.asarray(bias, jnp.float32).reshape(1, -1)
    return w_t_bf16, b_f32


@functools.partial(jax.jit, static_argnames=("tm",))
def linear_model_forward(x, w_t_bf16, bias_f32, *, tm=512):
    """x: (B, C, H, W) f32 -> (B, num_labels) f32."""
    B = x.shape[0]
    D, L = w_t_bf16.shape
    x2d = x.reshape(B, -1)                 # f32; no cast, no pad (no extra HBM passes)
    assert x2d.shape[1] == D, (x2d.shape, w_t_bf16.shape)

    # Batch tile: multiple of 8 sublanes, capped at 512 rows (VMEM on v7x),
    # and sized so the grid has >= 2 steps whenever B > 8 (v7x 2-TC split).
    tm = min(tm, max(8, _round_up(pl.cdiv(B, 2), 8)))
    grid_m = pl.cdiv(B, tm)

    cost = pl.CostEstimate(
        flops=2 * B * D * L,
        bytes_accessed=B * D * 4 + D * L * 2 + B * L * 4 + L * 4,
        transcendentals=0,
    )

    out = pl.pallas_call(
        linear_kernel,
        out_shape=jax.ShapeDtypeStruct((B, L), jnp.float32),
        grid=(grid_m,),
        in_specs=[
            pl.BlockSpec((tm, D), lambda i: (i, 0)),   # x tile: double-buffered stream
            pl.BlockSpec((D, L), lambda i: (0, 0)),    # weight: VMEM-resident
            pl.BlockSpec((1, L), lambda i: (0, 0)),    # bias:   VMEM-resident
        ],
        out_specs=pl.BlockSpec((tm, L), lambda i: (i, 0)),
        compiler_params=pltpu.CompilerParams(
            # Megacore chips split the batch grid across cores.
            # TODO(synk): on v7x, pltpu.CORE_PARALLEL / pl.core_map would
            # guarantee the 2-TensorCore split; kept "parallel" for
            # portability across v5e/v6e/v7x.
            dimension_semantics=("parallel",),
            vmem_limit_bytes=32 * 1024 * 1024,
        ),
        cost_estimate=cost,
    )(x2d, w_t_bf16, bias_f32)
    return out


def init_params(key, input_dim=3072, num_labels=2):
    # Deterministic init mimicking nn.Linear's uniform(-1/sqrt(D), 1/sqrt(D)).
    kw, kb = jax.random.split(key)
    bound = 1.0 / (input_dim ** 0.5)
    weight = jax.random.uniform(
        kw, (num_labels, input_dim), jnp.float32, minval=-bound, maxval=bound)
    bias = jax.random.uniform(
        kb, (num_labels,), jnp.float32, minval=-bound, maxval=bound)
    return weight, bias


if __name__ == "__main__":
    key = jax.random.PRNGKey(0)
    kx, kp = jax.random.split(key)

    # Small input consistent with input_dim=3072 -> (B=2, C=3, H=32, W=32)
    x = jax.random.normal(kx, (2, 3, 32, 32), jnp.float32)
    weight, bias = init_params(kp, input_dim=3072, num_labels=2)

    # One-time weight transpose/cast (static params, not per-call work).
    w_t_bf16, bias_f32 = prepare_params(weight, bias)

    out = linear_model_forward(x, w_t_bf16, bias_f32)
    out = jax.block_until_ready(out)
    assert out.shape == (2, 2)

    # Reference 1: same bf16 operand rounding as the kernel, f32 accumulate.
    x2d = x.reshape(x.shape[0], -1)
    ref_bf16 = (x2d.astype(jnp.bfloat16).astype(jnp.float32)
                @ w_t_bf16.astype(jnp.float32)) + bias
    assert jnp.allclose(out, ref_bf16, atol=1e-2, rtol=1e-2), (out, ref_bf16)

    # Reference 2: full-precision torch-equivalent forward (loose tolerance
    # covers the bf16 operand quantization over K=3072).
    ref_f32 = x2d @ weight.T + bias
    assert jnp.allclose(out, ref_f32, atol=5e-2, rtol=5e-2), (out, ref_f32)

    print("KERNEL_OK")
</pallas_src>

<mosaic_0001>
module attributes {stable_mosaic.version = 11 : i64} {
  func.func @linear_kernel(%arg0: i32, %arg1: memref<8x3072xf32, #tpu.memory_space<vmem>>, %arg2: memref<3072x2xbf16, #tpu.memory_space<vmem>>, %arg3: memref<1x2xf32, #tpu.memory_space<vmem>>, %arg4: memref<8x2xf32, #tpu.memory_space<vmem>>) attributes {dimension_semantics = [#tpu.dimension_semantics<parallel>], iteration_bounds = array<i64: 1>, scalar_prefetch = 0 : i64, scratch_operands = 0 : i64, tpu.core_type = #tpu.core_type<tc>, window_params = [{transform_indices = @transform_0, window_bounds = array<i64: 8, 3072>}, {pipeline_mode = #tpu.pipeline_mode<synchronous>, transform_indices = @transform_1, window_bounds = array<i64: 3072, 2>}, {pipeline_mode = #tpu.pipeline_mode<synchronous>, transform_indices = @transform_2, window_bounds = array<i64: 1, 2>}, {transform_indices = @transform_3, window_bounds = array<i64: 8, 2>}]} {
    %c0 = arith.constant 0 : index
    %c0_0 = arith.constant 0 : index
    %0 = vector.load %arg1[%c0, %c0_0] : memref<8x3072xf32, #tpu.memory_space<vmem>>, vector<8x3072xf32>
    %1 = arith.truncf %0 : vector<8x3072xf32> to vector<8x3072xbf16>
    %c0_1 = arith.constant 0 : index
    %c0_2 = arith.constant 0 : index
    %2 = vector.load %arg2[%c0_1, %c0_2] : memref<3072x2xbf16, #tpu.memory_space<vmem>>, vector<3072x2xbf16>
    %cst = arith.constant dense<0.000000e+00> : vector<8x2xf32>
    %3 = tpu.matmul %1, %2, %cst {dimension_numbers = #tpu.dot_dimension_numbers<[1], [0], [0], [1], [0, 0, 1, 1], [], []>} : vector<8x3072xbf16>, vector<3072x2xbf16>, vector<8x2xf32> -> vector<8x2xf32>
    %c0_3 = arith.constant 0 : index
    %c0_4 = arith.constant 0 : index
    %4 = vector.load %arg3[%c0_3, %c0_4] : memref<1x2xf32, #tpu.memory_space<vmem>>, vector<1x2xf32>
    %5 = vector.broadcast %4 : vector<1x2xf32> to vector<8x2xf32>
    %6 = arith.addf %3, %5 : vector<8x2xf32>
    %c0_5 = arith.constant 0 : index
    %c0_6 = arith.constant 0 : index
    %7 = vector.load %arg4[%c0_5, %c0_6] : memref<8x2xf32, #tpu.memory_space<vmem>>, vector<8x2xf32>
    tpu.vector_store %arg4[%c0_5, %c0_6], %6 {strides = array<i32>} : memref<8x2xf32, #tpu.memory_space<vmem>>, vector<8x2xf32>,
    return
  }
  func.func @transform_0(%arg0: i32) -> (i32, i32) {
    %c0_i32 = arith.constant 0 : i32
    %c0_i32_0 = arith.constant 0 : i32
    return %arg0, %c0_i32 : i32, i32
  }
  func.func @transform_1(%arg0: i32) -> (i32, i32) {
    %c0_i32 = arith.constant 0 : i32
    %c0_i32_0 = arith.constant 0 : i32
    %c0_i32_1 = arith.constant 0 : i32
    return %c0_i32, %c0_i32_0 : i32, i32
  }
  func.func @transform_2(%arg0: i32) -> (i32, i32) {
    %c0_i32 = arith.constant 0 : i32
    %c0_i32_0 = arith.constant 0 : i32
    %c0_i32_1 = arith.constant 0 : i32
    return %c0_i32, %c0_i32_0 : i32, i32
  }
  func.func @transform_3(%arg0: i32) -> (i32, i32) {
    %c0_i32 = arith.constant 0 : i32
    %c0_i32_0 = arith.constant 0 : i32
    return %arg0, %c0_i32 : i32, i32
  }
}

</mosaic_0001>

<bundles_post_ra>
// kernel: linear_model_forward.1
= control target key start
LH: loop header
LB: loop body
LE: loop exit
PB: predicated region body
PF: predicated region fallthrough
CT: control target
= control target key end

     0   :  { %8 = vsyncpa [#allocation3], 0  ;;  %vm2018_vm0 = vcmask 15360   ;;  %s3753_s0 = inlined_call_operand.vmem [shape: f32[2,3072], index: 0, kind: input, shape index: {}]   ;;  %s3754_s1 = inlined_call_operand.vmem [shape: bf16[3072,2], index: 1, kind: input, shape index: {}]   ;;  %s3755_s2 = inlined_call_operand.vmem [shape: f32[1,2], index: 2, kind: input, shape index: {}]   ;;  %s3756_s3 = inlined_call_operand.hbm [shape: f32[2,2], index: 3, kind: output, shape index: {}]  }
   0x1   :  { %v2813_v0 = vld [vmem:[%s3754_s1 + $0x38] sm:$0xff]  ;;  %v2812_v4 = vld [vmem:[%s3754_s1 + $0x30] sm:$0xff]  ;;  %v2811_v8 = vld [vmem:[%s3754_s1 + $0x28] sm:$0xff] }
   0x2   :  { %v2821_v1 = vld [vmem:[%s3754_s1 + $0x78] sm:$0xff]  ;;  %1706 = vmatpush.bf16.msra.mxu0 %v2813_v0  ;;  %v2820_v5 = vld [vmem:[%s3754_s1 + $0x70] sm:$0xff]  ;;  %v2819_v9 = vld [vmem:[%s3754_s1 + $0x68] sm:$0xff] }
   0x3   :  { %v2829_v2 = vld [vmem:[%s3754_s1 + $0xb8] sm:$0xff]  ;;  %1719 = vmatpush.bf16.msra.mxu1 %v2821_v1  ;;  %v2828_v6 = vld [vmem:[%s3754_s1 + $0xb0] sm:$0xff]  ;;  %v2827_v10 = vld [vmem:[%s3754_s1 + $0xa8] sm:$0xff] }
   0x4   :  { %v2837_v3 = vld [vmem:[%s3754_s1 + $0xf8] sm:$0xff]  ;;  %1732 = vmatpush.bf16.msra.mxu2 %v2829_v2  ;;  %v2836_v7 = vld [vmem:[%s3754_s1 + $0xf0] sm:$0xff]  ;;  %v2835_v11 = vld [vmem:[%s3754_s1 + $0xe8] sm:$0xff] }
   0x5   :  { %1745 = vmatpush.bf16.msra.mxu3 %v2837_v3  ;;  %v2810_v12 = vld [vmem:[%s3754_s1 + $0x20] sm:$0xff]  ;;  %v2809_v16 = vld [vmem:[%s3754_s1 + $0x18] sm:$0xff]  ;;  %v2808_v20 = vld [vmem:[%s3754_s1 + $0x10] sm:$0xff] }
   0x6   :  { %1707 = vmatpush.bf16.msra.mxu0 %v2812_v4  ;;  %v2818_v13 = vld [vmem:[%s3754_s1 + $0x60] sm:$0xff]  ;;  %v2817_v17 = vld [vmem:[%s3754_s1 + $0x58] sm:$0xff]  ;;  %v2816_v21 = vld [vmem:[%s3754_s1 + $0x50] sm:$0xff] }
   0x7   :  { %1720 = vmatpush.bf16.msra.mxu1 %v2820_v5  ;;  %v2826_v14 = vld [vmem:[%s3754_s1 + $0xa0] sm:$0xff]  ;;  %v2825_v18 = vld [vmem:[%s3754_s1 + $0x98] sm:$0xff]  ;;  %v21_v23 = vld [vmem:[%s3753_s0 + $0x30] sm:$0xff] }
   0x8   :  { %1733 = vmatpush.bf16.msra.mxu2 %v2828_v6  ;;  %v2834_v15 = vld [vmem:[%s3754_s1 + $0xe0] sm:$0xff]  ;;  %v2833_v19 = vld [vmem:[%s3754_s1 + $0xd8] sm:$0xff]  ;;  %v33_v25 = vld [vmem:[%s3753_s0 + $0x90] sm:$0xff]  ;;  %65 = vst [vmem:[#allocation1 + $0x1] ss:$4 sm:$0xff] %v21_v23 }
   0x9   :  { %1746 = vmatpush.bf16.msra.mxu3 %v2836_v7  ;;  %v15_v22 = vld [vmem:[%s3753_s0] sm:$0xff]  ;;  %v2824_v26 = vld [vmem:[%s3754_s1 + $0x90] sm:$0xff]  ;;  %69 = vst [vmem:[#allocation1 + $0x3] ss:$4 sm:$0xff] %v33_v25  ;;  %v2807_v28 = vld [vmem:[%s3754_s1 + $0x8] sm:$0xff] }
   0xa   :  { %1708 = vmatpush.bf16.msra.mxu0 %v2811_v8  ;;  %v27_v24 = vld [vmem:[%s3753_s0 + $0x60] sm:$0xff]  ;;  %63 = vst [vmem:[#allocation1] ss:$4 sm:$0xff] %v15_v22  ;;  %v2832_v27 = vld [vmem:[%s3754_s1 + $0xd0] sm:$0xff]  ;;  %v2815_v29 = vld [vmem:[%s3754_s1 + $0x48] sm:$0xff] }
   0xb   :  { %1721 = vmatpush.bf16.msra.mxu1 %v2819_v9  ;;  %67 = vst [vmem:[#allocation1 + $0x2] ss:$4 sm:$0xff] %v27_v24  ;;  %v2823_v30 = vld [vmem:[%s3754_s1 + $0x88] sm:$0xff]  ;;  %v2806_v32 = vld [vmem:[%s3754_s1] sm:$0xff]  ;;  %v2845_v36 = vld [vmem:[%s3754_s1 + $0x138] sm:$0xff] }
   0xc   :  { %1734 = vmatpush.bf16.msra.mxu2 %v2827_v10  ;;  %v2831_v31 = vld [vmem:[%s3754_s1 + $0xc8] sm:$0xff]  ;;  %v2814_v33 = vld [vmem:[%s3754_s1 + $0x40] sm:$0xff]  ;;  %v2853_v37 = vld [vmem:[%s3754_s1 + $0x178] sm:$0xff] }
   0xd   :  { %1747 = vmatpush.bf16.msra.mxu3 %v2835_v11  ;;  %v2822_v34 = vld [vmem:[%s3754_s1 + $0x80] sm:$0xff]  ;;  %v16_v38 = vld [vmem:[%s3753_s0 + $0x8] sm:$0xff]  ;;  %v2861_v39 = vld [vmem:[%s3754_s1 + $0x1b8] sm:$0xff] }
   0xe   :  { %1709 = vmatpush.bf16.msra.mxu0 %v2810_v12  ;;  %v2830_v35 = vld [vmem:[%s3754_s1 + $0xc0] sm:$0xff]  ;;  %v2869_v40 = vld [vmem:[%s3754_s1 + $0x1f8] sm:$0xff]  ;;  %v17_v41 = vld [vmem:[%s3753_s0 + $0x10] sm:$0xff]  ;;  %71 = vst [vmem:[#allocation1 + $0x20] ss:$4 sm:$0xff] %v16_v38 }
   0xf   :  { %1722 = vmatpush.bf16.msra.mxu1 %v2818_v13  ;;  %v23_v42 = vld [vmem:[%s3753_s0 + $0x40] sm:$0xff]  ;;  %v29_v43 = vld [vmem:[%s3753_s0 + $0x70] sm:$0xff]  ;;  %v22_v53 = vld [vmem:[%s3753_s0 + $0x38] sm:$0xff] }
  0x10   :  { %1735 = vmatpush.bf16.msra.mxu2 %v2826_v14  ;;  %v35_v50 = vld [vmem:[%s3753_s0 + $0xa0] sm:$0xff]  ;;  %v2844_v54 = vld [vmem:[%s3754_s1 + $0x130] sm:$0xff]  ;;  %v28_v56 = vld [vmem:[%s3753_s0 + $0x68] sm:$0xff]  ;;  %73 = vst [vmem:[#allocation1 + $0x21] ss:$4 sm:$0xff] %v22_v53 }
  0x11   :  { %1748 = vmatpush.bf16.msra.mxu3 %v2834_v15  ;;  %v2852_v55 = vld [vmem:[%s3754_s1 + $0x170] sm:$0xff]  ;;  %v34_v59 = vld [vmem:[%s3753_s0 + $0x98] sm:$0xff]  ;;  %75 = vst [vmem:[#allocation1 + $0x22] ss:$4 sm:$0xff] %v28_v56  ;;  %v2843_v60 = vld [vmem:[%s3754_s1 + $0x128] sm:$0xff] }
  0x12   :  { %1710 = vmatpush.bf16.msra.mxu0 %v2809_v16  ;;  %v80_v44 = vld.sshfl [vmem:[#allocation1 + $0x10] sm:$0xff pattern:$0x73625140]  ;;  %v78_v45 = vld.sshfl [vmem:[#allocation1] sm:$0xff pattern:$0x73625140] }
  0x13   :  { %1723 = vmatpush.bf16.msra.mxu1 %v2817_v17  ;;  %v81_v46 = vld.sshfl [vmem:[#allocation1 + $0x18] sm:$0xff pattern:$0x73625140]  ;;  %v79_v47 = vld.sshfl [vmem:[#allocation1 + $0x8] sm:$0xff pattern:$0x73625140]  ;;  %v144_v48 = vpack.c.bf16 %v80_v44, %v80_v44  ;;  %v142_v49 = vpack.c.bf16 %v78_v45, %v78_v45 }
  0x14   :  { %1736 = vmatpush.bf16.msra.mxu2 %v2825_v18  ;;  %86 = vst [vmem:[#allocation1] ss:$4 sm:$0xff] %v17_v41  ;;  %v145_v51 = vpack.c.bf16 %v81_v46, %v81_v46  ;;  %v143_v52 = vpack.c.bf16 %v79_v47, %v79_v47  ;;  %v2860_v57 = vld [vmem:[%s3754_s1 + $0x1b0] sm:$0xff]  ;;  %v2851_v61 = vld [vmem:[%s3754_s1 + $0x168] sm:$0xff]  ;;  %v2842_v0 = vld [vmem:[%s3754_s1 + $0x120] sm:$0xff] }
  0x15   :  { %1749 = vmatpush.bf16.msra.mxu3 %v2833_v19  ;;  %87 = vst [vmem:[#allocation1 + $0x1] ss:$4 sm:$0xff] %v23_v42  ;;  %v2868_v58 = vld [vmem:[%s3754_s1 + $0x1f0] sm:$0xff]  ;;  %v2859_v62 = vld [vmem:[%s3754_s1 + $0x1a8] sm:$0xff]  ;;  %v2850_v1 = vld [vmem:[%s3754_s1 + $0x160] sm:$0xff] }
  0x16   :  { %1711 = vmatpush.bf16.msra.mxu0 %v2808_v20  ;;  %88 = vst [vmem:[#allocation1 + $0x2] ss:$4 sm:$0xff] %v29_v43  ;;  %v2867_v63 = vld [vmem:[%s3754_s1 + $0x1e8] sm:$0xff]  ;;  %v2858_v2 = vld [vmem:[%s3754_s1 + $0x1a0] sm:$0xff]  ;;  %v2841_v4 = vld [vmem:[%s3754_s1 + $0x118] sm:$0xff] }
  0x17   :  { %1724 = vmatpush.bf16.msra.mxu1 %v2816_v21  ;;  %89 = vst [vmem:[#allocation1 + $0x3] ss:$4 sm:$0xff] %v35_v50  ;;  %v2866_v3 = vld [vmem:[%s3754_s1 + $0x1e0] sm:$0xff]  ;;  %v2849_v5 = vld [vmem:[%s3754_s1 + $0x158] sm:$0xff]  ;;  %v24_v7 = vld [vmem:[%s3753_s0 + $0x48] sm:$0xff] }
  0x18   :  { %1737 = vmatpush.bf16.msra.mxu2 %v2824_v26  ;;  %77 = vst [vmem:[#allocation1 + $0x23] ss:$4 sm:$0xff] %v34_v59  ;;  %v18_v6 = vld [vmem:[%s3753_s0 + $0x18] sm:$0xff]  ;;  %v36_v15 = vld [vmem:[%s3753_s0 + $0xa8] sm:$0xff]  ;;  %v2840_v16 = vld [vmem:[%s3754_s1 + $0x110] sm:$0xff] }
  0x19   :  { %1750 = vmatpush.bf16.msra.mxu3 %v2832_v27  ;;  %v30_v8 = vld [vmem:[%s3753_s0 + $0x78] sm:$0xff]  ;;  %v2848_v17 = vld [vmem:[%s3754_s1 + $0x150] sm:$0xff]  ;;  %v2839_v20 = vld [vmem:[%s3754_s1 + $0x108] sm:$0xff] }
  0x1a   :  { %1712 = vmatpush.bf16.msra.mxu0 %v2807_v28  ;;  %v2857_v13 = vld [vmem:[%s3754_s1 + $0x198] sm:$0xff]  ;;  %v2856_v18 = vld [vmem:[%s3754_s1 + $0x190] sm:$0xff]  ;;  %v2847_v21 = vld [vmem:[%s3754_s1 + $0x148] sm:$0xff] }
  0x1b   :  { %1725 = vmatpush.bf16.msra.mxu1 %v2815_v29  ;;  %v2865_v14 = vld [vmem:[%s3754_s1 + $0x1d8] sm:$0xff]  ;;  %v2864_v19 = vld [vmem:[%s3754_s1 + $0x1d0] sm:$0xff]  ;;  %v2855_v22 = vld [vmem:[%s3754_s1 + $0x188] sm:$0xff] }
  0x1c   :  { %1738 = vmatpush.bf16.msra.mxu2 %v2823_v30  ;;  %v2863_v23 = vld [vmem:[%s3754_s1 + $0x1c8] sm:$0xff]  ;;  %v2838_v24 = vld [vmem:[%s3754_s1 + $0x100] sm:$0xff]  ;;  %v2877_v28 = vld [vmem:[%s3754_s1 + $0x238] sm:$0xff] }
  0x1d   :  { %1751 = vmatpush.bf16.msra.mxu3 %v2831_v31  ;;  %v2846_v25 = vld [vmem:[%s3754_s1 + $0x140] sm:$0xff]  ;;  %v2885_v29 = vld [vmem:[%s3754_s1 + $0x278] sm:$0xff]  ;;  %v25_v45 = vld [vmem:[%s3753_s0 + $0x50] sm:$0xff] }
  0x1e   :  { %1713 = vmatpush.bf16.msra.mxu0 %v2806_v32  ;;  %v2854_v26 = vld [vmem:[%s3754_s1 + $0x180] sm:$0xff]  ;;  %v2893_v30 = vld [vmem:[%s3754_s1 + $0x2b8] sm:$0xff]  ;;  %v2876_v32 = vld [vmem:[%s3754_s1 + $0x230] sm:$0xff] }
  0x1f   :  { %1726 = vmatpush.bf16.msra.mxu1 %v2814_v33  ;;  %v3246_v9 = vld.sshfl [vmem:[#allocation1 + $0x30] sm:$0xff pattern:$0x73625140]  ;;  %v3248_v10 = vld.sshfl [vmem:[#allocation1 + $0x20] sm:$0xff pattern:$0x73625140] }
  0x20   :  { %1739 = vmatpush.bf16.msra.mxu2 %v2822_v34  ;;  %v3250_v11 = vld.sshfl [vmem:[#allocation1 + $0x38] sm:$0xff pattern:$0x73625140]  ;;  %v3252_v12 = vld.sshfl [vmem:[#allocation1 + $0x28] sm:$0xff pattern:$0x73625140]  ;;  %v148_v34 = vpack.c.bf16 %v3246_v9, %v3246_v9 }
  0x21   :  { %1752 = vmatpush.bf16.msra.mxu3 %v2830_v35  ;;  %1714 = vmatmul.bf16.vlgmr.msra.gmra.mxu0 %v142_v49  ;;  %90 = vst [vmem:[#allocation1 + $0x20] ss:$4 sm:$0xff] %v18_v6  ;;  %v2862_v27 = vld [vmem:[%s3754_s1 + $0x1c0] sm:$0xff]  ;;  %v2901_v31 = vld [vmem:[%s3754_s1 + $0x2f8] sm:$0xff]  ;;  %v2884_v33 = vld [vmem:[%s3754_s1 + $0x270] sm:$0xff]  ;;  %v146_v35 = vpack.c.bf16 %v3248_v10, %v3248_v10  ;;  %v149_v38 = vpack.c.bf16 %v3250_v11, %v3250_v11 }
  0x22   :  { %1758 = vmatpush.bf16.msrb.mxu0 %v2845_v36  ;;  %1727 = vmatmul.bf16.vlgmr.msra.gmra.mxu1 %v143_v52  ;;  %91 = vst [vmem:[#allocation1 + $0x21] ss:$4 sm:$0xff] %v24_v7  ;;  %v2892_v36 = vld [vmem:[%s3754_s1 + $0x2b0] sm:$0xff]  ;;  %v3335_v42 = vld.sshfl [vmem:[#allocation1 + $0x8] sm:$0xff pattern:$0x73625140] }
  0x23   :  { %1771 = vmatpush.bf16.msrb.mxu1 %v2853_v37  ;;  %1740 = vmatmul.bf16.vlgmr.msra.gmra.mxu2 %v144_v48  ;;  %92 = vst [vmem:[#allocation1 + $0x22] ss:$4 sm:$0xff] %v30_v8  ;;  %v2900_v37 = vld [vmem:[%s3754_s1 + $0x2f0] sm:$0xff]  ;;  %v3337_v43 = vld.sshfl [vmem:[#allocation1 + $0x18] sm:$0xff pattern:$0x73625140] }
  0x24   :  { %1784 = vmatpush.bf16.msrb.mxu2 %v2861_v39  ;;  %1753 = vmatmul.bf16.vlgmr.msra.gmra.mxu3 %v145_v51  ;;  %93 = vst [vmem:[#allocation1 + $0x23] ss:$4 sm:$0xff] %v36_v15  ;;  %v147_v39 = vpack.c.bf16 %v3252_v12, %v3252_v12  ;;  %v3333_v41 = vld.sshfl [vmem:[#allocation1 + $0x10] sm:$0xff pattern:$0x73625140]  ;;  %v19_v44 = vld [vmem:[%s3753_s0 + $0x20] sm:$0xff] }
  0x25   :  { %1797 = vmatpush.bf16.msrb.mxu3 %v2869_v40  ;;  %v3331_v40 = vld.sshfl [vmem:[#allocation1] sm:$0xff pattern:$0x73625140]  ;;  %v37_v47 = vld [vmem:[%s3753_s0 + $0xb0] sm:$0xff]  ;;  %v2875_v48 = vld [vmem:[%s3754_s1 + $0x228] sm:$0xff] }
  0x26   :  { %1759 = vmatpush.bf16.msrb.mxu0 %v2844_v54  ;;  %v31_v46 = vld [vmem:[%s3753_s0 + $0x80] sm:$0xff]  ;;  %102 = vst [vmem:[#allocation1] ss:$4 sm:$0xff] %v19_v44  ;;  %v2883_v49 = vld [vmem:[%s3754_s1 + $0x268] sm:$0xff]  ;;  %v2873_v56 = vld [vmem:[%s3754_s1 + $0x218] sm:$0xff]  ;;  %v150_v12 = vpack.c.bf16 %v3331_v40, %v3331_v40 }
  0x27   :  { %1772 = vmatpush.bf16.msrb.mxu1 %v2852_v55  ;;  %103 = vst [vmem:[#allocation1 + $0x1] ss:$4 sm:$0xff] %v25_v45  ;;  %v2891_v50 = vld [vmem:[%s3754_s1 + $0x2a8] sm:$0xff]  ;;  %v2874_v52 = vld [vmem:[%s3754_s1 + $0x220] sm:$0xff]  ;;  %v2897_v59 = vld [vmem:[%s3754_s1 + $0x2d8] sm:$0xff] }
  0x28   :  { %1785 = vmatpush.bf16.msrb.mxu2 %v2860_v57  ;;  %104 = vst [vmem:[#allocation1 + $0x2] ss:$4 sm:$0xff] %v31_v46  ;;  %v2899_v51 = vld [vmem:[%s3754_s1 + $0x2e8] sm:$0xff]  ;;  %v2882_v53 = vld [vmem:[%s3754_s1 + $0x260] sm:$0xff]  ;;  %v2881_v57 = vld [vmem:[%s3754_s1 + $0x258] sm:$0xff] }
  0x29   :  { %1798 = vmatpush.bf16.msrb.mxu3 %v2868_v58  ;;  %105 = vst [vmem:[#allocation1 + $0x3] ss:$4 sm:$0xff] %v37_v47  ;;  %v2890_v54 = vld [vmem:[%s3754_s1 + $0x2a0] sm:$0xff]  ;;  %v2889_v58 = vld [vmem:[%s3754_s1 + $0x298] sm:$0xff]  ;;  %v2916_v15 = vld [vmem:[%s3754_s1 + $0x370] sm:$0xff] }
  0x2a   :  { %1760 = vmatpush.bf16.msrb.mxu0 %v2843_v60  ;;  %v2898_v55 = vld [vmem:[%s3754_s1 + $0x2e0] sm:$0xff]  ;;  %v2872_v60 = vld [vmem:[%s3754_s1 + $0x210] sm:$0xff]  ;;  %v2909_v8 = vld [vmem:[%s3754_s1 + $0x338] sm:$0xff] }
  0x2b   :  { %1773 = vmatpush.bf16.msrb.mxu1 %v2851_v61  ;;  %v2880_v61 = vld [vmem:[%s3754_s1 + $0x250] sm:$0xff]  ;;  %v2886_v6 = vld [vmem:[%s3754_s1 + $0x280] sm:$0xff]  ;;  %v2917_v9 = vld [vmem:[%s3754_s1 + $0x378] sm:$0xff] }
  0x2c   :  { %1786 = vmatpush.bf16.msrb.mxu2 %v2859_v62  ;;  %v2888_v62 = vld [vmem:[%s3754_s1 + $0x290] sm:$0xff]  ;;  %v2894_v7 = vld [vmem:[%s3754_s1 + $0x2c0] sm:$0xff]  ;;  %v2925_v10 = vld [vmem:[%s3754_s1 + $0x3b8] sm:$0xff] }
  0x2d   :  { %1799 = vmatpush.bf16.msrb.mxu3 %v2867_v63  ;;  %v2896_v63 = vld [vmem:[%s3754_s1 + $0x2d0] sm:$0xff]  ;;  %v2933_v11 = vld [vmem:[%s3754_s1 + $0x3f8] sm:$0xff]  ;;  %v2903_v44 = vld [vmem:[%s3754_s1 + $0x308] sm:$0xff] }
  0x2e   :  { %1761 = vmatpush.bf16.msrb.mxu0 %v2842_v0  ;;  %v2871_v0 = vld [vmem:[%s3754_s1 + $0x208] sm:$0xff]  ;;  %v2904_v40 = vld [vmem:[%s3754_s1 + $0x310] sm:$0xff] }
  0x2f   :  { %1774 = vmatpush.bf16.msrb.mxu1 %v2850_v1  ;;  %v2879_v1 = vld [vmem:[%s3754_s1 + $0x248] sm:$0xff] }
  0x30   :  { %1787 = vmatpush.bf16.msrb.mxu2 %v2858_v2  ;;  %v2887_v2 = vld [vmem:[%s3754_s1 + $0x288] sm:$0xff] }
  0x31   :  { %1800 = vmatpush.bf16.msrb.mxu3 %v2866_v3  ;;  %v2895_v3 = vld [vmem:[%s3754_s1 + $0x2c8] sm:$0xff] }
  0x32   :  { %1762 = vmatpush.bf16.msrb.mxu0 %v2841_v4  ;;  %v2870_v4 = vld [vmem:[%s3754_s1 + $0x200] sm:$0xff]  ;;  %v2911_v45 = vld [vmem:[%s3754_s1 + $0x348] sm:$0xff] }
  0x33   :  { %1775 = vmatpush.bf16.msrb.mxu1 %v2849_v5  ;;  %v2878_v5 = vld [vmem:[%s3754_s1 + $0x240] sm:$0xff]  ;;  %v2919_v46 = vld [vmem:[%s3754_s1 + $0x388] sm:$0xff] }
  0x34   :  { %1788 = vmatpush.bf16.msrb.mxu2 %v2857_v13  ;;  %v152_v13 = vpack.c.bf16 %v3333_v41, %v3333_v41  ;;  %v2912_v41 = vld [vmem:[%s3754_s1 + $0x350] sm:$0xff]  ;;  %v2927_v47 = vld [vmem:[%s3754_s1 + $0x3c8] sm:$0xff] }
  0x35   :  { %1801 = vmatpush.bf16.msrb.mxu3 %v2865_v14  ;;  %v2908_v14 = vld [vmem:[%s3754_s1 + $0x330] sm:$0xff] }
  0x36   :  { %1763 = vmatpush.bf16.msrb.mxu0 %v2840_v16  ;;  %v151_v16 = vpack.c.bf16 %v3335_v42, %v3335_v42  ;;  %v2920_v42 = vld [vmem:[%s3754_s1 + $0x390] sm:$0xff] }
  0x37   :  { %1776 = vmatpush.bf16.msrb.mxu1 %v2848_v17  ;;  %v153_v17 = vpack.c.bf16 %v3337_v43, %v3337_v43  ;;  %v2928_v43 = vld [vmem:[%s3754_s1 + $0x3d0] sm:$0xff] }
  0x38   :  { %1789 = vmatpush.bf16.msrb.mxu2 %v2856_v18  ;;  %v2924_v18 = vld [vmem:[%s3754_s1 + $0x3b0] sm:$0xff] }
  0x39   :  { %1802 = vmatpush.bf16.msrb.mxu3 %v2864_v19  ;;  %v2932_v19 = vld [vmem:[%s3754_s1 + $0x3f0] sm:$0xff] }
  0x3a   :  { %1764 = vmatpush.bf16.msrb.mxu0 %v2839_v20  ;;  %v3455_v20 = vld.sshfl [vmem:[#allocation1 + $0x20] sm:$0xff pattern:$0x73625140] }
  0x3b   :  { %1777 = vmatpush.bf16.msrb.mxu1 %v2847_v21  ;;  %v3457_v21 = vld.sshfl [vmem:[#allocation1 + $0x30] sm:$0xff pattern:$0x73625140] }
  0x3c   :  { %1790 = vmatpush.bf16.msrb.mxu2 %v2855_v22  ;;  %v3459_v22 = vld.sshfl [vmem:[#allocation1 + $0x28] sm:$0xff pattern:$0x73625140] }
  0x3d   :  { %1803 = vmatpush.bf16.msrb.mxu3 %v2863_v23  ;;  %v3461_v23 = vld.sshfl [vmem:[#allocation1 + $0x38] sm:$0xff pattern:$0x73625140] }
  0x3e   :  { %1765 = vmatpush.bf16.msrb.mxu0 %v2838_v24  ;;  %v20_v24 = vld [vmem:[%s3753_s0 + $0x28] sm:$0xff] }
  0x3f   :  { %1778 = vmatpush.bf16.msrb.mxu1 %v2846_v25  ;;  %v26_v25 = vld [vmem:[%s3753_s0 + $0x58] sm:$0xff]  ;;  %106 = vst [vmem:[#allocation1 + $0x20] ss:$4 sm:$0xff] %v20_v24 }
  0x40   :  { %1791 = vmatpush.bf16.msrb.mxu2 %v2854_v26  ;;  %v32_v26 = vld [vmem:[%s3753_s0 + $0x88] sm:$0xff]  ;;  %107 = vst [vmem:[#allocation1 + $0x21] ss:$4 sm:$0xff] %v26_v25  ;;  %v2973_v24 = vld [vmem:[%s3754_s1 + $0x538] sm:$0xff] }
  0x41   :  { %1804 = vmatpush.bf16.msrb.mxu3 %v2862_v27  ;;  %1766 = vmatmul.bf16.vlgmr.msrb.gmra.mxu0 %v146_v35  ;;  %v38_v27 = vld [vmem:[%s3753_s0 + $0xb8] sm:$0xff]  ;;  %108 = vst [vmem:[#allocation1 + $0x22] ss:$4 sm:$0xff] %v32_v26  ;;  %v2930_v35 = vld [vmem:[%s3754_s1 + $0x3e0] sm:$0xff] }
  0x42   :  { %1810 = vmatpush.bf16.msra.mxu0 %v2877_v28  ;;  %1779 = vmatmul.bf16.vlgmr.msrb.gmra.mxu1 %v147_v39  ;;  %v2907_v28 = vld [vmem:[%s3754_s1 + $0x328] sm:$0xff]  ;;  %109 = vst [vmem:[#allocation1 + $0x23] ss:$4 sm:$0xff] %v38_v27  ;;  %v2929_v39 = vld [vmem:[%s3754_s1 + $0x3d8] sm:$0xff] }
  0x43   :  { %1823 = vmatpush.bf16.msra.mxu1 %v2885_v29  ;;  %1792 = vmatmul.bf16.vlgmr.msrb.gmra.mxu2 %v148_v34  ;;  %v2915_v29 = vld [vmem:[%s3754_s1 + $0x368] sm:$0xff]  ;;  %v2922_v34 = vld [vmem:[%s3754_s1 + $0x3a0] sm:$0xff]  ;;  %v2981_v25 = vld [vmem:[%s3754_s1 + $0x578] sm:$0xff] }
  0x44   :  { %1836 = vmatpush.bf16.msra.mxu2 %v2893_v30  ;;  %1805 = vmatmul.bf16.vlgmr.msrb.gmra.mxu3 %v149_v38  ;;  %v2923_v30 = vld [vmem:[%s3754_s1 + $0x3a8] sm:$0xff]  ;;  %v2921_v38 = vld [vmem:[%s3754_s1 + $0x398] sm:$0xff]  ;;  %v110_v26 = vld.sshfl [vmem:[#allocation1] sm:$0xff pattern:$0x73625140] }
  0x45   :  { %1849 = vmatpush.bf16.msra.mxu3 %v2901_v31  ;;  %v2931_v31 = vld [vmem:[%s3754_s1 + $0x3e8] sm:$0xff]  ;;  %v112_v27 = vld.sshfl [vmem:[#allocation1 + $0x10] sm:$0xff pattern:$0x73625140] }
  0x46   :  { %1811 = vmatpush.bf16.msra.mxu0 %v2876_v32  ;;  %v2906_v32 = vld [vmem:[%s3754_s1 + $0x320] sm:$0xff] }
  0x47   :  { %1824 = vmatpush.bf16.msra.mxu1 %v2884_v33  ;;  %v2914_v33 = vld [vmem:[%s3754_s1 + $0x360] sm:$0xff] }
  0x48   :  { %1837 = vmatpush.bf16.msra.mxu2 %v2892_v36  ;;  %v2905_v36 = vld [vmem:[%s3754_s1 + $0x318] sm:$0xff] }
  0x49   :  { %1850 = vmatpush.bf16.msra.mxu3 %v2900_v37  ;;  %v2913_v37 = vld [vmem:[%s3754_s1 + $0x358] sm:$0xff] }
  0x4a   :  { %1812 = vmatpush.bf16.msra.mxu0 %v2875_v48  ;;  %v2902_v48 = vld [vmem:[%s3754_s1 + $0x300] sm:$0xff] }
  0x4b   :  { %1825 = vmatpush.bf16.msra.mxu1 %v2883_v49  ;;  %v2910_v49 = vld [vmem:[%s3754_s1 + $0x340] sm:$0xff] }
  0x4c   :  { %1838 = vmatpush.bf16.msra.mxu2 %v2891_v50  ;;  %v2918_v50 = vld [vmem:[%s3754_s1 + $0x380] sm:$0xff] }
  0x4d   :  { %1851 = vmatpush.bf16.msra.mxu3 %v2899_v51  ;;  %v2926_v51 = vld [vmem:[%s3754_s1 + $0x3c0] sm:$0xff] }
  0x4e   :  { %1813 = vmatpush.bf16.msra.mxu0 %v2874_v52  ;;  %v2941_v52 = vld [vmem:[%s3754_s1 + $0x438] sm:$0xff] }
  0x4f   :  { %1826 = vmatpush.bf16.msra.mxu1 %v2882_v53  ;;  %v2949_v53 = vld [vmem:[%s3754_s1 + $0x478] sm:$0xff] }
  0x50   :  { %1839 = vmatpush.bf16.msra.mxu2 %v2890_v54  ;;  %v2957_v54 = vld [vmem:[%s3754_s1 + $0x4b8] sm:$0xff] }
  0x51   :  { %1852 = vmatpush.bf16.msra.mxu3 %v2898_v55  ;;  %v2965_v55 = vld [vmem:[%s3754_s1 + $0x4f8] sm:$0xff] }
  0x52   :  { %1814 = vmatpush.bf16.msra.mxu0 %v2873_v56  ;;  %v154_v56 = vpack.c.bf16 %v3455_v20, %v3455_v20  ;;  %v2934_v20 = vld [vmem:[%s3754_s1 + $0x400] sm:$0xff] }
  0x53   :  { %1827 = vmatpush.bf16.msra.mxu1 %v2881_v57  ;;  %v156_v57 = vpack.c.bf16 %v3457_v21, %v3457_v21  ;;  %v2942_v21 = vld [vmem:[%s3754_s1 + $0x440] sm:$0xff] }
  0x54   :  { %1840 = vmatpush.bf16.msra.mxu2 %v2889_v58  ;;  %v155_v58 = vpack.c.bf16 %v3459_v22, %v3459_v22  ;;  %v2950_v22 = vld [vmem:[%s3754_s1 + $0x480] sm:$0xff] }
  0x55   :  { %1853 = vmatpush.bf16.msra.mxu3 %v2897_v59  ;;  %v157_v59 = vpack.c.bf16 %v3461_v23, %v3461_v23  ;;  %v2958_v23 = vld [vmem:[%s3754_s1 + $0x4c0] sm:$0xff] }
  0x56   :  { %1815 = vmatpush.bf16.msra.mxu0 %v2872_v60  ;;  %v2940_v60 = vld [vmem:[%s3754_s1 + $0x430] sm:$0xff] }
  0x57   :  { %1828 = vmatpush.bf16.msra.mxu1 %v2880_v61  ;;  %v2948_v61 = vld [vmem:[%s3754_s1 + $0x470] sm:$0xff] }
  0x58   :  { %1841 = vmatpush.bf16.msra.mxu2 %v2888_v62  ;;  %v2956_v62 = vld [vmem:[%s3754_s1 + $0x4b0] sm:$0xff] }
  0x59   :  { %1854 = vmatpush.bf16.msra.mxu3 %v2896_v63  ;;  %v2964_v63 = vld [vmem:[%s3754_s1 + $0x4f0] sm:$0xff] }
  0x5a   :  { %1816 = vmatpush.bf16.msra.mxu0 %v2871_v0  ;;  %v2939_v0 = vld [vmem:[%s3754_s1 + $0x428] sm:$0xff] }
  0x5b   :  { %1829 = vmatpush.bf16.msra.mxu1 %v2879_v1  ;;  %v2947_v1 = vld [vmem:[%s3754_s1 + $0x468] sm:$0xff] }
  0x5c   :  { %1842 = vmatpush.bf16.msra.mxu2 %v2887_v2  ;;  %v2955_v2 = vld [vmem:[%s3754_s1 + $0x4a8] sm:$0xff] }
  0x5d   :  { %1855 = vmatpush.bf16.msra.mxu3 %v2895_v3  ;;  %v2963_v3 = vld [vmem:[%s3754_s1 + $0x4e8] sm:$0xff] }
  0x5e   :  { %1817 = vmatpush.bf16.msra.mxu0 %v2870_v4  ;;  %v2938_v4 = vld [vmem:[%s3754_s1 + $0x420] sm:$0xff] }
  0x5f   :  { %1830 = vmatpush.bf16.msra.mxu1 %v2878_v5  ;;  %v2946_v5 = vld [vmem:[%s3754_s1 + $0x460] sm:$0xff] }
  0x60   :  { %1843 = vmatpush.bf16.msra.mxu2 %v2886_v6  ;;  %v2954_v6 = vld [vmem:[%s3754_s1 + $0x4a0] sm:$0xff] }
  0x61   :  { %1856 = vmatpush.bf16.msra.mxu3 %v2894_v7  ;;  %1818 = vmatmul.bf16.vlgmr.msra.gmra.mxu0 %v150_v12  ;;  %v2962_v7 = vld [vmem:[%s3754_s1 + $0x4e0] sm:$0xff]  ;;  %v2936_v12 = vld [vmem:[%s3754_s1 + $0x410] sm:$0xff] }
  0x62   :  { %1862 = vmatpush.bf16.msrb.mxu0 %v2909_v8  ;;  %1831 = vmatmul.bf16.vlgmr.msra.gmra.mxu1 %v151_v16  ;;  %v2937_v8 = vld [vmem:[%s3754_s1 + $0x418] sm:$0xff]  ;;  %v2935_v16 = vld [vmem:[%s3754_s1 + $0x408] sm:$0xff] }
  0x63   :  { %1875 = vmatpush.bf16.msrb.mxu1 %v2917_v9  ;;  %1844 = vmatmul.bf16.vlgmr.msra.gmra.mxu2 %v152_v13  ;;  %v2945_v9 = vld [vmem:[%s3754_s1 + $0x458] sm:$0xff]  ;;  %v2944_v13 = vld [vmem:[%s3754_s1 + $0x450] sm:$0xff] }
  0x64   :  { %1888 = vmatpush.bf16.msrb.mxu2 %v2925_v10  ;;  %1857 = vmatmul.bf16.vlgmr.msra.gmra.mxu3 %v153_v17  ;;  %v2953_v10 = vld [vmem:[%s3754_s1 + $0x498] sm:$0xff]  ;;  %v2943_v17 = vld [vmem:[%s3754_s1 + $0x448] sm:$0xff] }
  0x65   :  { %1901 = vmatpush.bf16.msrb.mxu3 %v2933_v11  ;;  %v2961_v11 = vld [vmem:[%s3754_s1 + $0x4d8] sm:$0xff] }
  0x66   :  { %1863 = vmatpush.bf16.msrb.mxu0 %v2908_v14  ;;  %v2952_v14 = vld [vmem:[%s3754_s1 + $0x490] sm:$0xff] }
  0x67   :  { %1876 = vmatpush.bf16.msrb.mxu1 %v2916_v15  ;;  %v2960_v15 = vld [vmem:[%s3754_s1 + $0x4d0] sm:$0xff] }
  0x68   :  { %1889 = vmatpush.bf16.msrb.mxu2 %v2924_v18  ;;  %v2951_v18 = vld [vmem:[%s3754_s1 + $0x488] sm:$0xff] }
  0x69   :  { %1902 = vmatpush.bf16.msrb.mxu3 %v2932_v19  ;;  %v2959_v19 = vld [vmem:[%s3754_s1 + $0x4c8] sm:$0xff] }
  0x6a   :  { %1864 = vmatpush.bf16.msrb.mxu0 %v2907_v28  ;;  %v111_v28 = vld.sshfl [vmem:[#allocation1 + $0x8] sm:$0xff pattern:$0x73625140] }
  0x6b   :  { %1877 = vmatpush.bf16.msrb.mxu1 %v2915_v29  ;;  %v113_v29 = vld.sshfl [vmem:[#allocation1 + $0x18] sm:$0xff pattern:$0x73625140] }
  0x6c   :  { %1890 = vmatpush.bf16.msrb.mxu2 %v2923_v30  ;;  %v2989_v30 = vld [vmem:[%s3754_s1 + $0x5b8] sm:$0xff] }
  0x6d   :  { %1903 = vmatpush.bf16.msrb.mxu3 %v2931_v31  ;;  %v2997_v31 = vld [vmem:[%s3754_s1 + $0x5f8] sm:$0xff] }
  0x6e   :  { %1865 = vmatpush.bf16.msrb.mxu0 %v2906_v32  ;;  %v158_v32 = vpack.c.bf16 %v110_v26, %v110_v26 }
  0x6f   :  { %1878 = vmatpush.bf16.msrb.mxu1 %v2914_v33  ;;  %v160_v33 = vpack.c.bf16 %v112_v27, %v112_v27 }
  0x70   :  { %1891 = vmatpush.bf16.msrb.mxu2 %v2922_v34  ;;  %v159_v34 = vpack.c.bf16 %v111_v28, %v111_v28 }
  0x71   :  { %1904 = vmatpush.bf16.msrb.mxu3 %v2930_v35  ;;  %v161_v35 = vpack.c.bf16 %v113_v29, %v113_v29 }
  0x72   :  { %1866 = vmatpush.bf16.msrb.mxu0 %v2905_v36  ;;  %v2972_v36 = vld [vmem:[%s3754_s1 + $0x530] sm:$0xff] }
  0x73   :  { %1879 = vmatpush.bf16.msrb.mxu1 %v2913_v37  ;;  %v2980_v37 = vld [vmem:[%s3754_s1 + $0x570] sm:$0xff] }
  0x74   :  { %1892 = vmatpush.bf16.msrb.mxu2 %v2921_v38  ;;  %v2988_v38 = vld [vmem:[%s3754_s1 + $0x5b0] sm:$0xff] }
  0x75   :  { %1905 = vmatpush.bf16.msrb.mxu3 %v2929_v39  ;;  %v2996_v39 = vld [vmem:[%s3754_s1 + $0x5f0] sm:$0xff] }
  0x76   :  { %1867 = vmatpush.bf16.msrb.mxu0 %v2904_v40  ;;  %v2971_v40 = vld [vmem:[%s3754_s1 + $0x528] sm:$0xff] }
  0x77   :  { %1880 = vmatpush.bf16.msrb.mxu1 %v2912_v41  ;;  %v2979_v41 = vld [vmem:[%s3754_s1 + $0x568] sm:$0xff] }
  0x78   :  { %1893 = vmatpush.bf16.msrb.mxu2 %v2920_v42  ;;  %v3001_v42 = vld [vmem:[%s3755_s2] ss:$0 sm:$0xff] }
  0x79   :  { %1906 = vmatpush.bf16.msrb.mxu3 %v2928_v43  ;;  %v2987_v43 = vld [vmem:[%s3754_s1 + $0x5a8] sm:$0xff] }
  0x7a   :  { %1868 = vmatpush.bf16.msrb.mxu0 %v2903_v44  ;;  %v2995_v44 = vld [vmem:[%s3754_s1 + $0x5e8] sm:$0xff] }
  0x7b   :  { %1881 = vmatpush.bf16.msrb.mxu1 %v2911_v45 }
  0x7c   :  { %1894 = vmatpush.bf16.msrb.mxu2 %v2919_v46  ;;  %v2970_v46 = vld [vmem:[%s3754_s1 + $0x520] sm:$0xff] }
  0x7d   :  { %1907 = vmatpush.bf16.msrb.mxu3 %v2927_v47  ;;  %v2978_v47 = vld [vmem:[%s3754_s1 + $0x560] sm:$0xff] }
  0x7e   :  { %1869 = vmatpush.bf16.msrb.mxu0 %v2902_v48 }
  0x7f   :  { %1882 = vmatpush.bf16.msrb.mxu1 %v2910_v49 }
  0x80   :  { %1895 = vmatpush.bf16.msrb.mxu2 %v2918_v50  ;;  %v2986_v50 = vld [vmem:[%s3754_s1 + $0x5a0] sm:$0xff] }
  0x81   :  { %1908 = vmatpush.bf16.msrb.mxu3 %v2926_v51  ;;  %1870 = vmatmul.bf16.vlgmr.msrb.gmra.mxu0 %v154_v56  ;;  %v2994_v51 = vld [vmem:[%s3754_s1 + $0x5e0] sm:$0xff]  ;;  %v2993_v56 = vld [vmem:[%s3754_s1 + $0x5d8] sm:$0xff] }
  0x82   :  { %1914 = vmatpush.bf16.msra.mxu0 %v2941_v52  ;;  %1883 = vmatmul.bf16.vlgmr.msrb.gmra.mxu1 %v155_v58 }
  0x83   :  { %1927 = vmatpush.bf16.msra.mxu1 %v2949_v53  ;;  %1896 = vmatmul.bf16.vlgmr.msrb.gmra.mxu2 %v156_v57  ;;  %v2969_v53 = vld [vmem:[%s3754_s1 + $0x518] sm:$0xff] }
  0x84   :  { %1940 = vmatpush.bf16.msra.mxu2 %v2957_v54  ;;  %1909 = vmatmul.bf16.vlgmr.msrb.gmra.mxu3 %v157_v59  ;;  %v2977_v54 = vld [vmem:[%s3754_s1 + $0x558] sm:$0xff] }
  0x85   :  { %1953 = vmatpush.bf16.msra.mxu3 %v2965_v55  ;;  %v2985_v55 = vld [vmem:[%s3754_s1 + $0x598] sm:$0xff] }
  0x86   :  { %1915 = vmatpush.bf16.msra.mxu0 %v2940_v60 }
  0x87   :  { %1928 = vmatpush.bf16.msra.mxu1 %v2948_v61  ;;  %v2968_v61 = vld [vmem:[%s3754_s1 + $0x510] sm:$0xff] }
  0x88   :  { %1941 = vmatpush.bf16.msra.mxu2 %v2956_v62  ;;  %v2976_v62 = vld [vmem:[%s3754_s1 + $0x550] sm:$0xff] }
  0x89   :  { %1954 = vmatpush.bf16.msra.mxu3 %v2964_v63 }
  0x8a   :  { %1916 = vmatpush.bf16.msra.mxu0 %v2939_v0 }
  0x8b   :  { %1929 = vmatpush.bf16.msra.mxu1 %v2947_v1  ;;  %v2984_v1 = vld [vmem:[%s3754_s1 + $0x590] sm:$0xff] }
  0x8c   :  { %1942 = vmatpush.bf16.msra.mxu2 %v2955_v2  ;;  %v2992_v2 = vld [vmem:[%s3754_s1 + $0x5d0] sm:$0xff] }
  0x8d   :  { %1955 = vmatpush.bf16.msra.mxu3 %v2963_v3  ;;  %v2967_v3 = vld [vmem:[%s3754_s1 + $0x508] sm:$0xff] }
  0x8e   :  { %1917 = vmatpush.bf16.msra.mxu0 %v2938_v4  ;;  %v2975_v4 = vld [vmem:[%s3754_s1 + $0x548] sm:$0xff] }
  0x8f   :  { %1930 = vmatpush.bf16.msra.mxu1 %v2946_v5  ;;  %v2983_v5 = vld [vmem:[%s3754_s1 + $0x588] sm:$0xff] }
  0x90   :  { %1943 = vmatpush.bf16.msra.mxu2 %v2954_v6  ;;  %v2991_v6 = vld [vmem:[%s3754_s1 + $0x5c8] sm:$0xff] }
  0x91   :  { %1956 = vmatpush.bf16.msra.mxu3 %v2962_v7 }
  0x92   :  { %1918 = vmatpush.bf16.msra.mxu0 %v2937_v8  ;;  %v2966_v8 = vld [vmem:[%s3754_s1 + $0x500] sm:$0xff] }
  0x93   :  { %1931 = vmatpush.bf16.msra.mxu1 %v2945_v9 }
  0x94   :  { %1944 = vmatpush.bf16.msra.mxu2 %v2953_v10  ;;  %v2974_v10 = vld [vmem:[%s3754_s1 + $0x540] sm:$0xff] }
  0x95   :  { %1957 = vmatpush.bf16.msra.mxu3 %v2961_v11  ;;  %v2982_v11 = vld [vmem:[%s3754_s1 + $0x580] sm:$0xff] }
  0x96   :  { %1919 = vmatpush.bf16.msra.mxu0 %v2936_v12  ;;  %v2990_v12 = vld [vmem:[%s3754_s1 + $0x5c0] sm:$0xff] }
  0x97   :  { %1932 = vmatpush.bf16.msra.mxu1 %v2944_v13  ;;  %v114_v13 = vld.sshfl [vmem:[#allocation1 + $0x20] sm:$0xff pattern:$0x73625140] }
  0x98   :  { %1945 = vmatpush.bf16.msra.mxu2 %v2952_v14  ;;  %v115_v14 = vld.sshfl [vmem:[#allocation1 + $0x28] sm:$0xff pattern:$0x73625140] }
  0x99   :  { %1958 = vmatpush.bf16.msra.mxu3 %v2960_v15  ;;  %v116_v15 = vld.sshfl [vmem:[#allocation1 + $0x30] sm:$0xff pattern:$0x73625140] }
  0x9a   :  { %1920 = vmatpush.bf16.msra.mxu0 %v2935_v16  ;;  %v117_v16 = vld.sshfl [vmem:[#allocation1 + $0x38] sm:$0xff pattern:$0x73625140] }
  0x9b   :  { %1933 = vmatpush.bf16.msra.mxu1 %v2943_v17  ;;  %v162_v17 = vpack.c.bf16 %v114_v13, %v114_v13 }
  0x9c   :  { %1946 = vmatpush.bf16.msra.mxu2 %v2951_v18  ;;  %v163_v18 = vpack.c.bf16 %v115_v14, %v115_v14 }
  0x9d   :  { %1959 = vmatpush.bf16.msra.mxu3 %v2959_v19  ;;  %v164_v19 = vpack.c.bf16 %v116_v15, %v116_v15 }
  0x9e   :  { %1921 = vmatpush.bf16.msra.mxu0 %v2934_v20  ;;  %v1715_v45 = vpop.f32.mrf.mxu0  ;;  %v165_v20 = vpack.c.bf16 %v117_v16, %v117_v16 }
  0x9f   :  { %1934 = vmatpush.bf16.msra.mxu1 %v2942_v21  ;;  %v1716_v48 = vadd.f32 %v3001_v42, %v1715_v45  ;;  %v1728_v49 = vpop.f32.mrf.mxu1 }
  0xa0   :  { %1947 = vmatpush.bf16.msra.mxu2 %v2950_v22 }
  0xa1   :  { %1960 = vmatpush.bf16.msra.mxu3 %v2958_v23  ;;  %1922 = vmatmul.bf16.vlgmr.msra.gmra.mxu0 %v158_v32  ;;  %v1729_v52 = vadd.f32 %v1728_v49, %v1716_v48 }
  0xa2   :  { %1966 = vmatpush.bf16.msrb.mxu0 %v2973_v24  ;;  %1935 = vmatmul.bf16.vlgmr.msra.gmra.mxu1 %v159_v34 }
  0xa3   :  { %1979 = vmatpush.bf16.msrb.mxu1 %v2981_v25  ;;  %1948 = vmatmul.bf16.vlgmr.msra.gmra.mxu2 %v160_v33 }
  0xa4   :  { %1992 = vmatpush.bf16.msrb.mxu2 %v2989_v30  ;;  %1961 = vmatmul.bf16.vlgmr.msra.gmra.mxu3 %v161_v35 }
  0xa5   :  { %2005 = vmatpush.bf16.msrb.mxu3 %v2997_v31 }
  0xa6   :  { %1967 = vmatpush.bf16.msrb.mxu0 %v2972_v36  ;;  %v1741_v57 = vpop.f32.mrf.mxu2  ;;  %v1717_v60 = vpop.f32.mrf.mxu0 }
  0xa7   :  { %1980 = vmatpush.bf16.msrb.mxu1 %v2980_v37  ;;  %v1742_v58 = vadd.f32 %v1741_v57, %v1729_v52  ;;  %v1754_v59 = vpop.f32.mrf.mxu3  ;;  %v1730_v0 = vpop.f32.mrf.mxu1 }
  0xa8   :  { %1993 = vmatpush.bf16.msrb.mxu2 %v2988_v38 }
  0xa9   :  { %2006 = vmatpush.bf16.msrb.mxu3 %v2996_v39  ;;  %v1755_v63 = vadd.f32 %v1754_v59, %v1742_v58 }
  0xaa   :  { %1968 = vmatpush.bf16.msrb.mxu0 %v2971_v40 }
  0xab   :  { %1981 = vmatpush.bf16.msrb.mxu1 %v2979_v41 }
  0xac   :  { %1994 = vmatpush.bf16.msrb.mxu2 %v2987_v43 }
  0xad   :  { %2007 = vmatpush.bf16.msrb.mxu3 %v2995_v44 }
  0xae   :  { %1969 = vmatpush.bf16.msrb.mxu0 %v2970_v46  ;;  %v1743_v7 = vpop.f32.mrf.mxu2 }
  0xaf   :  { %1982 = vmatpush.bf16.msrb.mxu1 %v2978_v47  ;;  %v1756_v9 = vpop.f32.mrf.mxu3 }
  0xb0   :  { %1995 = vmatpush.bf16.msrb.mxu2 %v2986_v50 }
  0xb1   :  { %2008 = vmatpush.bf16.msrb.mxu3 %v2994_v51 }
  0xb2   :  { %1970 = vmatpush.bf16.msrb.mxu0 %v2969_v53 }
  0xb3   :  { %1983 = vmatpush.bf16.msrb.mxu1 %v2977_v54 }
  0xb4   :  { %1996 = vmatpush.bf16.msrb.mxu2 %v2985_v55 }
  0xb5   :  { %2009 = vmatpush.bf16.msrb.mxu3 %v2993_v56 }
  0xb6   :  { %1971 = vmatpush.bf16.msrb.mxu0 %v2968_v61 }
  0xb7   :  { %1984 = vmatpush.bf16.msrb.mxu1 %v2976_v62 }
  0xb8   :  { %1997 = vmatpush.bf16.msrb.mxu2 %v2984_v1 }
  0xb9   :  { %2010 = vmatpush.bf16.msrb.mxu3 %v2992_v2 }
  0xba   :  { %1972 = vmatpush.bf16.msrb.mxu0 %v2967_v3 }
  0xbb   :  { %1985 = vmatpush.bf16.msrb.mxu1 %v2975_v4 }
  0xbc   :  { %1998 = vmatpush.bf16.msrb.mxu2 %v2983_v5 }
  0xbd   :  { %2011 = vmatpush.bf16.msrb.mxu3 %v2991_v6 }
  0xbe   :  { %1973 = vmatpush.bf16.msrb.mxu0 %v2966_v8  ;;  %v1767_v21 = vpop.f32.mrf.mxu0 }
  0xbf   :  { %1986 = vmatpush.bf16.msrb.mxu1 %v2974_v10  ;;  %v1768_v22 = vadd.f32 %v1767_v21, %v1755_v63  ;;  %v1780_v23 = vpop.f32.mrf.mxu1 }
  0xc0   :  { %1999 = vmatpush.bf16.msrb.mxu2 %v2982_v11 }
  0xc1   :  { %2012 = vmatpush.bf16.msrb.mxu3 %v2990_v12  ;;  %1974 = vmatmul.bf16.vlgmr.msrb.gmra.mxu0 %v162_v17  ;;  %v1781_v24 = vadd.f32 %v1780_v23, %v1768_v22 }
  0xc2   :  { %1987 = vmatmul.bf16.vlgmr.msrb.gmra.mxu1 %v163_v18 }
  0xc3   :  { %2000 = vmatmul.bf16.vlgmr.msrb.gmra.mxu2 %v164_v19 }
  0xc4   :  { %2013 = vmatmul.bf16.vlgmr.msrb.gmra.mxu3 %v165_v20 }
  0xc6   :  { %v1793_v25 = vpop.f32.mrf.mxu2  ;;  %v1769_v28 = vpop.f32.mrf.mxu0 }
  0xc7   :  { %v1794_v26 = vadd.f32 %v1793_v25, %v1781_v24  ;;  %v1806_v27 = vpop.f32.mrf.mxu3  ;;  %v1782_v30 = vpop.f32.mrf.mxu1 }
  0xc9   :  { %v1807_v29 = vadd.f32 %v1806_v27, %v1794_v26 }
  0xce   :  { %v1795_v31 = vpop.f32.mrf.mxu2 }
  0xcf   :  { %v1808_v32 = vpop.f32.mrf.mxu3 }
  0xde   :  { %v1819_v33 = vpop.f32.mrf.mxu0 }
  0xdf   :  { %v1820_v34 = vadd.f32 %v1819_v33, %v1807_v29  ;;  %v1832_v35 = vpop.f32.mrf.mxu1 }
  0xe1   :  { %v1833_v36 = vadd.f32 %v1832_v35, %v1820_v34 }
  0xe6   :  { %v1845_v37 = vpop.f32.mrf.mxu2  ;;  %v1821_v40 = vpop.f32.mrf.mxu0 }
  0xe7   :  { %v1846_v38 = vadd.f32 %v1845_v37, %v1833_v36  ;;  %v1858_v39 = vpop.f32.mrf.mxu3  ;;  %v1834_v42 = vpop.f32.mrf.mxu1 }
  0xe9   :  { %v1859_v41 = vadd.f32 %v1858_v39, %v1846_v38 }
  0xee   :  { %v1847_v43 = vpop.f32.mrf.mxu2 }
  0xef   :  { %v1860_v44 = vpop.f32.mrf.mxu3 }
  0xfe   :  { %v1871_v45 = vpop.f32.mrf.mxu0 }
  0xff   :  { %v1884_v46 = vpop.f32.mrf.mxu1  ;;  %v1872_v56 = vadd.f32 %v1871_v45, %v1859_v41 }
 0x101   :  { %v1885_v60 = vadd.f32 %v1884_v46, %v1872_v56 }
 0x106   :  { %v1897_v47 = vpop.f32.mrf.mxu2  ;;  %v1873_v49 = vpop.f32.mrf.mxu0 }
 0x107   :  { %v1910_v48 = vpop.f32.mrf.mxu3  ;;  %v1886_v50 = vpop.f32.mrf.mxu1  ;;  %v1898_v61 = vadd.f32 %v1897_v47, %v1885_v60 }
 0x109   :  { %v1911_v0 = vadd.f32 %v1910_v48, %v1898_v61 }
 0x10e   :  { %v1899_v51 = vpop.f32.mrf.mxu2 }
 0x10f   :  { %v1912_v52 = vpop.f32.mrf.mxu3 }
 0x11e   :  { %v1923_v53 = vpop.f32.mrf.mxu0 }
 0x11f   :  { %v1936_v54 = vpop.f32.mrf.mxu1  ;;  %v1924_v1 = vadd.f32 %v1923_v53, %v1911_v0 }
 0x121   :  { %v1937_v2 = vadd.f32 %v1936_v54, %v1924_v1 }
 0x126   :  { %v1949_v55 = vpop.f32.mrf.mxu2  ;;  %v1925_v58 = vpop.f32.mrf.mxu0 }
 0x127   :  { %v1962_v57 = vpop.f32.mrf.mxu3  ;;  %v1938_v59 = vpop.f32.mrf.mxu1  ;;  %v1950_v3 = vadd.f32 %v1949_v55, %v1937_v2 }
 0x129   :  { %v1963_v4 = vadd.f32 %v1962_v57, %v1950_v3 }
 0x12e   :  { %v1951_v62 = vpop.f32.mrf.mxu2 }
 0x12f   :  { %v1964_v63 = vpop.f32.mrf.mxu3 }
 0x13e   :  { %v1975_v5 = vpop.f32.mrf.mxu0 }
 0x13f   :  { %v1988_v6 = vpop.f32.mrf.mxu1  ;;  %v1976_v7 = vadd.f32 %v1975_v5, %v1963_v4 }
 0x141   :  { %v1989_v8 = vadd.f32 %v1988_v6, %v1976_v7 }
 0x146   :  { %v2001_v9 = vpop.f32.mrf.mxu2  ;;  %v1977_v12 = vpop.f32.mrf.mxu0 }
 0x147   :  { %v2014_v10 = vpop.f32.mrf.mxu3  ;;  %v2002_v11 = vadd.f32 %v2001_v9, %v1989_v8  ;;  %v1990_v13 = vpop.f32.mrf.mxu1 }
 0x149   :  { %v2015_v14 = vadd.f32 %v2014_v10, %v2002_v11 }
 0x14b   :  { %2019 = vst.msk [vmem:[#allocation2] sm:$0xff] %vm2018_vm0, %v2015_v14 }
 0x14e   :  { %v2003_v15 = vpop.f32.mrf.mxu2 }
 0x14f   :  { %v2016_v16 = vpop.f32.mrf.mxu3 }
 0x150   :  { %2023 = vsyncadd [#allocation3], 96  ;;  %s2026_s6 = sshll.u32 %s3756_s3, 4  ;;  %s3028_s7 = smov [#allocation2]   ;;  %s2027_s6 = int_to_ptr.hbm [resolvable:$true] %s2026_s6 }
 0x151   :  { %s2024_s8 = sshll.u32 %s3028_s7, 4  ;;  %s3029_s9 = smov 32   ;;  %s2025_s8 = int_to_ptr.vmem [resolvable:$true] %s2024_s8 }
 0x152   :  { %s3030_s10 = smov 2  }
 0x153   :  { %2032 = dma.vmem_to_hbm [thread:$0]  %s2025_s8, 32, %s2027_s6, [#allocation3], %s3029_s9, %s3029_s9, %s3030_s10  }
 0x154   :  { %3026 = dma.done.wait [#allocation3], 128  }
 0x155   :  { %3027 = vsyncadd [#allocation3], 4294967168 }
 0x156   :  { %2037 = vsyncpa [#allocation3], 1 }

</bundles_post_ra>
